<compile_context>
chip_gen: v7x
topology: tpu7x:2x2x1
jax: 0.10.0
libtpu: 0.0.40
codegen_flags: <defaults>
</compile_context>

<pallas_src>
import jax
import jax.numpy as jnp
from jax.experimental import pallas as pl
from jax.experimental.pallas import tpu as pltpu

IN_PAD = 64     # input_size 57 -> 64 (sublane-aligned rows of W_ih^T)
OUT_PAD = 128   # output_size 18 -> 128 (lane-dense logits / output store)


def _rnn_seq_kernel(x_ref, h0_ref, wih_ref, whh_ref, b_ref, wlin_ref, blin_ref,
                    out_ref, hn_ref, h_scratch):
    """One grid step == one time step of the tanh RNN + Linear + LogSoftmax."""
    t = pl.program_id(0)

    # Seed the recurrent state once; it persists in VMEM scratch across steps.
    @pl.when(t == 0)
    def _():
        h_scratch[...] = h0_ref[...]

    x = x_ref[0]                   # (1, IN_PAD)  bf16 (one-hot, exact)
    h = h_scratch[...]             # (1, H)       f32

    # Pre-activation: x @ W_ih^T + h @ W_hh^T + (b_ih + b_hh), f32 accumulation.
    pre = (jnp.dot(x, wih_ref[...], preferred_element_type=jnp.float32)
           + jnp.dot(h.astype(whh_ref.dtype), whh_ref[...],
                     preferred_element_type=jnp.float32)
           + b_ref[...])
    h_new = jnp.tanh(pre)          # (1, H) f32 (EUP)
    h_scratch[...] = h_new

    # Linear + LogSoftmax. Padded output lanes carry a -1e30 bias, so they
    # contribute exp(...) == 0 to the log-sum-exp and are sliced off outside.
    logits = (jnp.dot(h_new.astype(wlin_ref.dtype), wlin_ref[...],
                      preferred_element_type=jnp.float32)
              + blin_ref[...])     # (1, OUT_PAD) f32
    m = jnp.max(logits, axis=-1, keepdims=True)
    lse = jnp.log(jnp.sum(jnp.exp(logits - m), axis=-1, keepdims=True)) + m
    out_ref[0] = logits - lse

    # hn block has a constant index map -> stays resident, written back once.
    hn_ref[...] = h_new


def init_params(key, input_size, hidden_size, output_size):
    """PyTorch-layout parameters (nn.RNN + nn.Linear init ranges)."""
    k = 1.0 / (hidden_size ** 0.5)
    keys = jax.random.split(key, 6)
    u = lambda kk, shape: jax.random.uniform(kk, shape, jnp.float32,
                                             minval=-k, maxval=k)
    return {
        "w_ih": u(keys[0], (hidden_size, input_size)),
        "w_hh": u(keys[1], (hidden_size, hidden_size)),
        "b_ih": u(keys[2], (hidden_size,)),
        "b_hh": u(keys[3], (hidden_size,)),
        "w_lin": u(keys[4], (output_size, hidden_size)),
        "b_lin": u(keys[5], (output_size,)),
    }


def prepare_params(raw, in_pad=IN_PAD, out_pad=OUT_PAD):
    """One-time parameter prep: transpose, pad, pre-sum biases, cast to bf16."""
    H = raw["w_hh"].shape[0]
    in_sz = raw["w_ih"].shape[1]
    out_sz = raw["w_lin"].shape[0]
    assert in_sz <= in_pad and out_sz <= out_pad and H % 128 == 0

    wih_t = (jnp.zeros((in_pad, H), jnp.float32)
             .at[:in_sz, :].set(raw["w_ih"].T)).astype(jnp.bfloat16)
    whh_t = raw["w_hh"].T.astype(jnp.bfloat16)                       # (H, H)
    b = (raw["b_ih"] + raw["b_hh"]).reshape(1, H).astype(jnp.float32)
    wlin_t = (jnp.zeros((H, out_pad), jnp.float32)
              .at[:, :out_sz].set(raw["w_lin"].T)).astype(jnp.bfloat16)
    blin = (jnp.full((1, out_pad), -1e30, jnp.float32)
            .at[0, :out_sz].set(raw["b_lin"]))
    return {"wih_t": wih_t, "whh_t": whh_t, "b": b,
            "wlin_t": wlin_t, "blin": blin,
            "dims": (in_sz, in_pad, H, out_sz, out_pad)}


def rnn_forward(prep, inputs, hidden):
    """Equivalent to repeatedly calling RNN.forward(letter_t, hidden) over a name.

    inputs: (seq_len, 1, input_size) one-hot letters (lineToTensor(line))
    hidden: (num_layers=1, 1, hidden_size)
    returns (log_probs: (seq_len, 1, output_size), hn: (1, 1, hidden_size))
    """
    in_sz, in_pad, H, out_sz, out_pad = prep["dims"]
    seq_len = inputs.shape[0]

    x = jnp.zeros((seq_len, 1, in_pad), jnp.float32)
    x = x.at[:, :, :in_sz].set(inputs.reshape(seq_len, 1, in_sz)
                               .astype(jnp.float32))
    x = x.astype(jnp.bfloat16)
    h0 = hidden.reshape(1, H).astype(jnp.float32)

    weight_bytes = (in_pad * H + H * H + H * out_pad) * 2 + (H + out_pad) * 4
    cost = pl.CostEstimate(
        flops=2 * seq_len * (in_pad * H + H * H + H * out_pad),
        transcendentals=seq_len * (H + out_pad),
        bytes_accessed=weight_bytes + x.size * 2
                       + seq_len * out_pad * 4 + 2 * H * 4)

    const2d = lambda t: (0, 0)

    out_padded, hn = pl.pallas_call(
        _rnn_seq_kernel,
        out_shape=(
            jax.ShapeDtypeStruct((seq_len, 1, out_pad), jnp.float32),
            jax.ShapeDtypeStruct((1, H), jnp.float32),
        ),
        grid=(seq_len,),
        in_specs=[
            pl.BlockSpec((1, 1, in_pad), lambda t: (t, 0, 0)),   # x_t
            pl.BlockSpec((1, H), const2d),                       # h0
            pl.BlockSpec((in_pad, H), const2d),                  # W_ih^T (resident)
            pl.BlockSpec((H, H), const2d),                       # W_hh^T (resident)
            pl.BlockSpec((1, H), const2d),                       # b_ih + b_hh
            pl.BlockSpec((H, out_pad), const2d),                 # W_lin^T (resident)
            pl.BlockSpec((1, out_pad), const2d),                 # b_lin (-1e30 pad)
        ],
        out_specs=(
            pl.BlockSpec((1, 1, out_pad), lambda t: (t, 0, 0)),  # per-step log-probs
            pl.BlockSpec((1, H), const2d),                       # hn (resident)
        ),
        scratch_shapes=[pltpu.VMEM((1, H), jnp.float32)],        # recurrent h
        compiler_params=pltpu.CompilerParams(
            dimension_semantics=("arbitrary",)),                 # serial recurrence
        cost_estimate=cost,
    )(x, h0, prep["wih_t"], prep["whh_t"], prep["b"],
      prep["wlin_t"], prep["blin"])

    return out_padded[:, :, :out_sz], hn.reshape(1, 1, H)


def reference_forward(raw, inputs, hidden):
    """Pure-JAX f32 reference: nn.RNN(tanh) -> Linear -> LogSoftmax per step."""
    H = raw["w_hh"].shape[0]
    h = hidden.reshape(1, H)
    outs = []
    for t in range(inputs.shape[0]):
        x = inputs[t].reshape(1, -1)
        h = jnp.tanh(x @ raw["w_ih"].T + raw["b_ih"]
                     + h @ raw["w_hh"].T + raw["b_hh"])
        logits = h @ raw["w_lin"].T + raw["b_lin"]
        outs.append(jax.nn.log_softmax(logits, axis=-1))
    return jnp.stack(outs, axis=0), h.reshape(1, 1, H)


if __name__ == "__main__":
    import string
    all_letters = string.ascii_letters + " .,;'"
    input_size = len(all_letters)     # n_letters = 57
    hidden_size = 128                 # n_hidden
    output_size = 18                  # n_categories is empty in the snippet;
                                      # use the classic tutorial's 18 categories.

    key = jax.random.PRNGKey(0)
    raw = init_params(key, input_size, hidden_size, output_size)
    prep = prepare_params(raw)        # one-time prep (transpose/pad/bf16/bias-sum)

    # lineToTensor('Bai'): (seq_len=3, batch=1, n_letters) one-hot letters.
    line = "Bai"
    inputs = jnp.zeros((len(line), 1, input_size), jnp.float32)
    for t, ch in enumerate(line):
        inputs = inputs.at[t, 0, all_letters.find(ch)].set(1.0)
    hidden0 = jnp.zeros((1, 1, hidden_size), jnp.float32)   # RNN.initHidden()

    out, hn = rnn_forward(prep, inputs, hidden0)
    jax.block_until_ready((out, hn))

    ref_out, ref_hn = reference_forward(raw, inputs, hidden0)
    assert out.shape == (len(line), 1, output_size)
    assert hn.shape == (1, 1, hidden_size)
    # bf16 weights -> loosened tolerance vs. the pure-f32 reference.
    assert jnp.allclose(out, ref_out, atol=3e-2), float(jnp.max(jnp.abs(out - ref_out)))
    assert jnp.allclose(hn, ref_hn, atol=3e-2), float(jnp.max(jnp.abs(hn - ref_hn)))

    print("KERNEL_OK")
</pallas_src>

<mosaic_0001>
module attributes {stable_mosaic.version = 11 : i64} {
  func.func @_rnn_seq_kernel(%arg0: i32, %arg1: memref<1x1x64xbf16, #tpu.memory_space<vmem>>, %arg2: memref<1x128xf32, #tpu.memory_space<vmem>>, %arg3: memref<64x128xbf16, #tpu.memory_space<vmem>>, %arg4: memref<128x128xbf16, #tpu.memory_space<vmem>>, %arg5: memref<1x128xf32, #tpu.memory_space<vmem>>, %arg6: memref<128x128xbf16, #tpu.memory_space<vmem>>, %arg7: memref<1x128xf32, #tpu.memory_space<vmem>>, %arg8: memref<1x1x128xf32, #tpu.memory_space<vmem>>, %arg9: memref<1x128xf32, #tpu.memory_space<vmem>>, %arg10: memref<1x128xf32, #tpu.memory_space<vmem>>) attributes {dimension_semantics = [#tpu.dimension_semantics<arbitrary>], iteration_bounds = array<i64: 3>, scalar_prefetch = 0 : i64, scratch_operands = 1 : i64, tpu.core_type = #tpu.core_type<tc>, window_params = [{transform_indices = @transform_0, window_bounds = array<i64: 1, 1, 64>}, {pipeline_mode = #tpu.pipeline_mode<synchronous>, transform_indices = @transform_1, window_bounds = array<i64: 1, 128>}, {pipeline_mode = #tpu.pipeline_mode<synchronous>, transform_indices = @transform_2, window_bounds = array<i64: 64, 128>}, {pipeline_mode = #tpu.pipeline_mode<synchronous>, transform_indices = @transform_3, window_bounds = array<i64: 128, 128>}, {pipeline_mode = #tpu.pipeline_mode<synchronous>, transform_indices = @transform_4, window_bounds = array<i64: 1, 128>}, {pipeline_mode = #tpu.pipeline_mode<synchronous>, transform_indices = @transform_5, window_bounds = array<i64: 128, 128>}, {pipeline_mode = #tpu.pipeline_mode<synchronous>, transform_indices = @transform_6, window_bounds = array<i64: 1, 128>}, {transform_indices = @transform_7, window_bounds = array<i64: 1, 1, 128>}, {pipeline_mode = #tpu.pipeline_mode<synchronous>, transform_indices = @transform_8, window_bounds = array<i64: 1, 128>}]} {
    %c0_i32 = arith.constant 0 : i32
    %0 = arith.cmpi eq, %arg0, %c0_i32 : i32
    %1 = arith.extui %0 : i1 to i32
    %c0_i32_0 = arith.constant 0 : i32
    %2 = arith.cmpi ne, %1, %c0_i32_0 : i32
    scf.if %2 {
      %c0_26 = arith.constant 0 : index
      %c0_27 = arith.constant 0 : index
      %36 = vector.load %arg2[%c0_26, %c0_27] : memref<1x128xf32, #tpu.memory_space<vmem>>, vector<1x128xf32>
      %c0_28 = arith.constant 0 : index
      %c0_29 = arith.constant 0 : index
      %37 = vector.load %arg10[%c0_28, %c0_29] : memref<1x128xf32, #tpu.memory_space<vmem>>, vector<1x128xf32>
      tpu.vector_store %arg10[%c0_28, %c0_29], %36 {strides = array<i32>} : memref<1x128xf32, #tpu.memory_space<vmem>>, vector<1x128xf32>,
    } else {
    }
    %c0 = arith.constant 0 : index
    %c0_1 = arith.constant 0 : index
    %c0_2 = arith.constant 0 : index
    %3 = vector.load %arg1[%c0, %c0_1, %c0_2] : memref<1x1x64xbf16, #tpu.memory_space<vmem>>, vector<1x1x64xbf16>
    %4 = vector.shape_cast %3 : vector<1x1x64xbf16> to vector<1x64xbf16>
    %c0_3 = arith.constant 0 : index
    %c0_4 = arith.constant 0 : index
    %5 = vector.load %arg10[%c0_3, %c0_4] : memref<1x128xf32, #tpu.memory_space<vmem>>, vector<1x128xf32>
    %c0_5 = arith.constant 0 : index
    %c0_6 = arith.constant 0 : index
    %6 = vector.load %arg3[%c0_5, %c0_6] : memref<64x128xbf16, #tpu.memory_space<vmem>>, vector<64x128xbf16>
    %cst = arith.constant dense<0.000000e+00> : vector<1x128xf32>
    %7 = tpu.matmul %4, %6, %cst {dimension_numbers = #tpu.dot_dimension_numbers<[1], [0], [0], [1], [0, 0, 1, 1], [], []>} : vector<1x64xbf16>, vector<64x128xbf16>, vector<1x128xf32> -> vector<1x128xf32>
    %8 = arith.truncf %5 : vector<1x128xf32> to vector<1x128xbf16>
    %c0_7 = arith.constant 0 : index
    %c0_8 = arith.constant 0 : index
    %9 = vector.load %arg4[%c0_7, %c0_8] : memref<128x128xbf16, #tpu.memory_space<vmem>>, vector<128x128xbf16>
    %cst_9 = arith.constant dense<0.000000e+00> : vector<1x128xf32>
    %10 = tpu.matmul %8, %9, %cst_9 {dimension_numbers = #tpu.dot_dimension_numbers<[1], [0], [0], [1], [0, 0, 1, 1], [], []>} : vector<1x128xbf16>, vector<128x128xbf16>, vector<1x128xf32> -> vector<1x128xf32>
    %11 = arith.addf %7, %10 : vector<1x128xf32>
    %c0_10 = arith.constant 0 : index
    %c0_11 = arith.constant 0 : index
    %12 = vector.load %arg5[%c0_10, %c0_11] : memref<1x128xf32, #tpu.memory_space<vmem>>, vector<1x128xf32>
    %13 = arith.addf %11, %12 : vector<1x128xf32>
    %14 = math.tanh %13 : vector<1x128xf32>
    %c0_12 = arith.constant 0 : index
    %c0_13 = arith.constant 0 : index
    %15 = vector.load %arg10[%c0_12, %c0_13] : memref<1x128xf32, #tpu.memory_space<vmem>>, vector<1x128xf32>
    tpu.vector_store %arg10[%c0_12, %c0_13], %14 {strides = array<i32>} : memref<1x128xf32, #tpu.memory_space<vmem>>, vector<1x128xf32>,
    %16 = arith.truncf %14 : vector<1x128xf32> to vector<1x128xbf16>
    %c0_14 = arith.constant 0 : index
    %c0_15 = arith.constant 0 : index
    %17 = vector.load %arg6[%c0_14, %c0_15] : memref<128x128xbf16, #tpu.memory_space<vmem>>, vector<128x128xbf16>
    %cst_16 = arith.constant dense<0.000000e+00> : vector<1x128xf32>
    %18 = tpu.matmul %16, %17, %cst_16 {dimension_numbers = #tpu.dot_dimension_numbers<[1], [0], [0], [1], [0, 0, 1, 1], [], []>} : vector<1x128xbf16>, vector<128x128xbf16>, vector<1x128xf32> -> vector<1x128xf32>
    %c0_17 = arith.constant 0 : index
    %c0_18 = arith.constant 0 : index
    %19 = vector.load %arg7[%c0_17, %c0_18] : memref<1x128xf32, #tpu.memory_space<vmem>>, vector<1x128xf32>
    %20 = arith.addf %18, %19 : vector<1x128xf32>
    %cst_19 = arith.constant dense<0xFF800000> : vector<1xf32>
    %21 = vector.multi_reduction <maximumf>, %20, %cst_19 [1] : vector<1x128xf32> to vector<1xf32>
    %22 = vector.shape_cast %21 : vector<1xf32> to vector<1x1xf32>
    %23 = vector.broadcast %22 : vector<1x1xf32> to vector<1x128xf32>
    %24 = arith.subf %20, %23 : vector<1x128xf32>
    %25 = math.exp %24 : vector<1x128xf32>
    %cst_20 = arith.constant dense<0.000000e+00> : vector<1xf32>
    %26 = vector.multi_reduction <add>, %25, %cst_20 [1] : vector<1x128xf32> to vector<1xf32>
    %27 = vector.shape_cast %26 : vector<1xf32> to vector<1x1xf32>
    %28 = math.log %27 : vector<1x1xf32>
    %29 = arith.addf %28, %22 : vector<1x1xf32>
    %30 = vector.broadcast %29 : vector<1x1xf32> to vector<1x128xf32>
    %31 = arith.subf %20, %30 : vector<1x128xf32>
    %c0_21 = arith.constant 0 : index
    %c0_22 = arith.constant 0 : index
    %c0_23 = arith.constant 0 : index
    %32 = vector.load %arg8[%c0_21, %c0_22, %c0_23] : memref<1x1x128xf32, #tpu.memory_space<vmem>>, vector<1x1x128xf32>
    %33 = vector.shape_cast %32 : vector<1x1x128xf32> to vector<1x128xf32>
    %34 = vector.shape_cast %31 : vector<1x128xf32> to vector<1x1x128xf32>
    tpu.vector_store %arg8[%c0_21, %c0_22, %c0_23], %34 {strides = array<i32>} : memref<1x1x128xf32, #tpu.memory_space<vmem>>, vector<1x1x128xf32>,
    %c0_24 = arith.constant 0 : index
    %c0_25 = arith.constant 0 : index
    %35 = vector.load %arg9[%c0_24, %c0_25] : memref<1x128xf32, #tpu.memory_space<vmem>>, vector<1x128xf32>
    tpu.vector_store %arg9[%c0_24, %c0_25], %14 {strides = array<i32>} : memref<1x128xf32, #tpu.memory_space<vmem>>, vector<1x128xf32>,
    return
  }
  func.func @transform_0(%arg0: i32) -> (i32, i32, i32) {
    %c0_i32 = arith.constant 0 : i32
    %c0_i32_0 = arith.constant 0 : i32
    %c0_i32_1 = arith.constant 0 : i32
    return %arg0, %c0_i32, %c0_i32_0 : i32, i32, i32
  }
  func.func @transform_1(%arg0: i32) -> (i32, i32) {
    %c0_i32 = arith.constant 0 : i32
    %c0_i32_0 = arith.constant 0 : i32
    %c0_i32_1 = arith.constant 0 : i32
    return %c0_i32, %c0_i32_0 : i32, i32
  }
  func.func @transform_2(%arg0: i32) -> (i32, i32) {
    %c0_i32 = arith.constant 0 : i32
    %c0_i32_0 = arith.constant 0 : i32
    %c0_i32_1 = arith.constant 0 : i32
    return %c0_i32, %c0_i32_0 : i32, i32
  }
  func.func @transform_3(%arg0: i32) -> (i32, i32) {
    %c0_i32 = arith.constant 0 : i32
    %c0_i32_0 = arith.constant 0 : i32
    %c0_i32_1 = arith.constant 0 : i32
    return %c0_i32, %c0_i32_0 : i32, i32
  }
  func.func @transform_4(%arg0: i32) -> (i32, i32) {
    %c0_i32 = arith.constant 0 : i32
    %c0_i32_0 = arith.constant 0 : i32
    %c0_i32_1 = arith.constant 0 : i32
    return %c0_i32, %c0_i32_0 : i32, i32
  }
  func.func @transform_5(%arg0: i32) -> (i32, i32) {
    %c0_i32 = arith.constant 0 : i32
    %c0_i32_0 = arith.constant 0 : i32
    %c0_i32_1 = arith.constant 0 : i32
    return %c0_i32, %c0_i32_0 : i32, i32
  }
  func.func @transform_6(%arg0: i32) -> (i32, i32) {
    %c0_i32 = arith.constant 0 : i32
    %c0_i32_0 = arith.constant 0 : i32
    %c0_i32_1 = arith.constant 0 : i32
    return %c0_i32, %c0_i32_0 : i32, i32
  }
  func.func @transform_7(%arg0: i32) -> (i32, i32, i32) {
    %c0_i32 = arith.constant 0 : i32
    %c0_i32_0 = arith.constant 0 : i32
    %c0_i32_1 = arith.constant 0 : i32
    return %arg0, %c0_i32, %c0_i32_0 : i32, i32, i32
  }
  func.func @transform_8(%arg0: i32) -> (i32, i32) {
    %c0_i32 = arith.constant 0 : i32
    %c0_i32_0 = arith.constant 0 : i32
    %c0_i32_1 = arith.constant 0 : i32
    return %c0_i32, %c0_i32_0 : i32, i32
  }
}

</mosaic_0001>

<bundles_post_ra>
// kernel: tpu_custom_call.1
= control target key start
LH: loop header
LB: loop body
LE: loop exit
PB: predicated region body
PF: predicated region fallthrough
CT: control target
= control target key end

     0   :  { %14 = vsyncpa [#allocation4], 0  ;;  %s1520_s0 = inlined_call_operand.vmem [shape: bf16[3,1,64], index: 0, kind: input, shape index: {}]   ;;  %s1521_s1 = inlined_call_operand.vmem [shape: f32[1,128], index: 1, kind: input, shape index: {}]   ;;  %s1522_s2 = inlined_call_operand.hbm [shape: bf16[64,128], index: 2, kind: input, shape index: {}]   ;;  %s1523_s3 = inlined_call_operand.hbm [shape: bf16[128,128], index: 3, kind: input, shape index: {}]   ;;  %s1524_s4 = inlined_call_operand.vmem [shape: f32[1,128], index: 4, kind: input, shape index: {}]   ;;  %s1525_s5 = inlined_call_operand.hbm [shape: bf16[128,128], index: 5, kind: input, shape index: {}]   ;;  %s1526_s6 = inlined_call_operand.vmem [shape: f32[1,128], index: 6, kind: input, shape index: {}]   ;;  %s1527_s7 = inlined_call_operand.hbm [shape: f32[3,1,128], index: 7, kind: output, shape index: {0}]   ;;  %s1528_s8 = inlined_call_operand.hbm [shape: f32[1,128], index: 8, kind: output, shape index: {1}]  }
   0x1   :  { %15 = vsyncpa [#allocation7], 0 }
   0x2   :  { %16 = vsyncpa [#allocation5], 0 }
   0x3   :  { %18 = vsyncpa [#allocation5 + $0x1], 0 }
   0x4   :  { %19 = vsyncpa [#allocation11], 0  ;;  %s1233_s27 = smov 0   ;;  %s1235_s28 = smov 0  }
   0x5   :  { %s1237_s29 = smov 0   ;;  %s1239_s30 = smov 0  }
   0x6 LB: > { %1537 = sst [smem:[#allocation16_spill]] %s1173_s29  ;;  %s1254_s9 = sadd.s32 4294967295, %s1177_s30   ;;  %s1177_s30 = sphi %s1239_s30, %s1560_s30   ;;  %s1173_s29 = sphi %s1237_s29, %s1562_s29   ;;  %s1169_s28 = sphi %s1235_s28, %s1564_s28   ;;  %s1165_s27 = sphi %s1233_s27, %s1563_s27  }
   0x7   : > { %s774_s10 = sadd.s32 4294967294, %s1177_s30   ;;  %s1258_s11 = sadd.s32 1, %s1177_s30  }
   0x8   : > { %1538 = sst [smem:[#allocation17_spill]] %s1258_s11  ;;  %s184_s12 = sadd.s32 1, %s1173_s29 }
   0x9   : > { %s181_s13 = ssub.s32 %s1177_s30, %s1258_s11  ;;  %p194_p0 = scmp.ne.s32.totalorder %s1173_s29, %s1169_s28 }
   0xa   : > { %p182_p1 = scmp.eq.s32.totalorder %s181_s13, 0  ;;  %p1529_p2 = scmp.eq.s32.totalorder %s1254_s9, 2 }
   0xb   : > { %p200_p3 = scmp.ne.s32.totalorder %s1169_s28, %s1165_s27  ;;  %p201_p4 = scmp.eq.s32.totalorder %s774_s10, 2 }
   0xc   : > { %s1269_s14 = scalar_select %p182_p1, %s1173_s29, %s184_s12  }
   0xd   : > { %p1273_p5 = por %p1529_p2, %p194_p0  ;;  %p1277_p6 = por %p201_p4, %p200_p3 }
   0xe   : > { %1539 = sst [smem:[#allocation18_spill]] %s1269_s14  ;;  %p775_p7 = scmp.ge.s32.totalorder %s1177_s30, 1 }
   0xf   : > { %s1540_s15 = scalar_select %p1273_p5, 1, 0 }
  0x10   : > { %s1541_s16 = scalar_select %p1277_p6, 1, 0 }
  0x11   : > { %p229_p8 = scmp.lt.s32.totalorder %s1177_s30, 4  ;;  %p1530_p10 = scmp.eq.s32.totalorder %s1254_s9, 0 }
  0x12   : > { %1542 = sst [smem:[#allocation19_spill]] %s1541_s16  ;;  %s1179_s18 = smov [#allocation6]  }
  0x13   : > { %p1285_p11 = pnand %p775_p7, %p229_p8  ;;  %s257_s19 = sshll.u32 %s1179_s18, 4  ;;  %s1291_s19 = int_to_ptr.vmem [resolvable:$true] %s257_s19 }
  0x14   : > { %s1180_s21 = smov [#allocation3]   ;;  %s1181_s23 = smov [#allocation8]  }
  0x15   : > { %s1543_s17 = scalar_select %p1285_p11, 1, 0 }
  0x16   : > { %p904_p12 = pneg %p1285_p11  ;;  %s244_s22 = sshll.u32 %s1180_s21, 4  ;;  %s1299_s22 = int_to_ptr.vmem [resolvable:$true] %s244_s22 }
  0x17   : > { %s1301_s24 = sshll.u32 %s1181_s23, 4  ;;  %s993_s10 = scalar_lea.hbm %s1523_s3, 1024  ;;  %s274_s24 = int_to_ptr.vmem [resolvable:$true] %s1301_s24 }
  0x18   : > { %p1295_p13 = pnand %p1530_p10, %p904_p12  ;;  %p994_p0 = scmp.ne.s32.totalorder %s1523_s3, %s993_s10 }
  0x19   : > { %p1000_p7 = scmp.lt.u32.totalorder %s993_s10, %s1523_s3 }
  0x1a   : > { %p1311_p1 = pneg %p1295_p13 }
  0x1c   : > { %p996_p3 = pnand %p1311_p1, %p994_p0 }
  0x1e   : > { %p997_p4 = pneg %p996_p3 }
  0x20   : > { %p1002_p8 = pnand %p1000_p7, %p997_p4 }
  0x22   : > { %1005 = shalt.err (!%p1002_p8)
}
  0x23   : > { %s1006_s25 = scalar_lea.vmem %s1291_s19, 1024  ;;  %p1014_p10 = scmp.lt.s32.totalorder %s1291_s19, %s1291_s19 }
  0x24   : > { %p1007_p12 = scmp.ne.s32.totalorder %s1291_s19, %s1006_s25  ;;  %p1015_p6 = scmp.lt.s32.totalorder %s1006_s25, %s1006_s25 }
  0x26   : > { %p1009_p2 = pnand %p1007_p12, %p1311_p1  ;;  %p1016_p0 = por %p1015_p6, %p1014_p10 }
  0x28   : > { %p1010_p9 = pneg %p1009_p2 }
  0x2a   : > { %p1017_p3 = pnand %p1016_p0, %p1010_p9 }
  0x2c   : > { %1020 = shalt.err (!%p1017_p3)
}
  0x2d   : > { %s1182_s26 = smov 64   ;;  %s1183_s10 = smov 4  }
  0x2e   : > { %910 = dma.hbm_to_vmem [thread:$0]  (!%p1295_p13), %s1523_s3, 1024, %s1291_s19, [#allocation7], %s1182_s26, %s1182_s26, %s1183_s10  }
  0x2f   : > { %s1021_s25 = scalar_lea.hbm %s1522_s2, 512 }
  0x30   : > { %p1022_p2 = scmp.ne.s32.totalorder %s1522_s2, %s1021_s25  ;;  %p1028_p10 = scmp.lt.u32.totalorder %s1021_s25, %s1522_s2 }
  0x32   : > { %p1024_p6 = pnand %p1022_p2, %p1311_p1 }
  0x34   : > { %p1025_p9 = pneg %p1024_p6 }
  0x36   : > { %p1030_p4 = pnand %p1028_p10, %p1025_p9 }
  0x38   : > { %1033 = shalt.err (!%p1030_p4)
}
  0x39   : > { %s1034_s19 = scalar_lea.vmem %s1299_s22, 512  ;;  %p1042_p0 = scmp.lt.s32.totalorder %s1299_s22, %s1299_s22 }
  0x3a   : > { %p1035_p7 = scmp.ne.s32.totalorder %s1299_s22, %s1034_s19  ;;  %p1043_p3 = scmp.lt.s32.totalorder %s1034_s19, %s1034_s19 }
  0x3c   : > { %p1037_p8 = pnand %p1035_p7, %p1311_p1  ;;  %p1044_p2 = por %p1043_p3, %p1042_p0 }
  0x3e   : > { %p1038_p12 = pneg %p1037_p8 }
  0x40   : > { %p1045_p6 = pnand %p1044_p2, %p1038_p12 }
  0x42   : > { %1048 = shalt.err (!%p1045_p6)
}
  0x43   : > { %907 = dma.hbm_to_vmem [thread:$0]  (!%p1295_p13), %s1522_s2, 512, %s1299_s22, [#allocation4], %s1182_s26, %s1182_s26, %s1183_s10  }
  0x44   : > { %s1049_s12 = scalar_lea.hbm %s1525_s5, 1024 }
  0x45   : > { %p1050_p9 = scmp.ne.s32.totalorder %s1525_s5, %s1049_s12  ;;  %p1056_p7 = scmp.lt.u32.totalorder %s1049_s12, %s1525_s5 }
  0x47   : > { %p1052_p10 = pnand %p1050_p9, %p1311_p1 }
  0x49   : > { %p1053_p4 = pneg %p1052_p10 }
  0x4b   : > { %p1058_p8 = pnand %p1056_p7, %p1053_p4 }
  0x4d   : > { %1061 = shalt.err (!%p1058_p8)
}
  0x4e   : > { %s1062_s19 = scalar_lea.vmem %s274_s24, 1024  ;;  %p1070_p2 = scmp.lt.s32.totalorder %s274_s24, %s274_s24 }
  0x4f   : > { %p1063_p12 = scmp.ne.s32.totalorder %s274_s24, %s1062_s19  ;;  %p1071_p6 = scmp.lt.s32.totalorder %s1062_s19, %s1062_s19 }
  0x51   : > { %p1065_p0 = pnand %p1063_p12, %p1311_p1  ;;  %p1072_p5 = por %p1071_p6, %p1070_p2 }
  0x53   : > { %p1066_p3 = pneg %p1065_p0 }
  0x55   : > { %p1073_p11 = pnand %p1072_p5, %p1066_p3 }
  0x57   : > { %1076 = shalt.err (!%p1073_p11)
}
  0x58   : > { %913 = dma.hbm_to_vmem [thread:$0]  (!%p1295_p13), %s1525_s5, 1024, %s274_s24, [#allocation7], %s1182_s26, %s1182_s26, %s1183_s10  }
  0x59   : > { %p1546_p9 = scmp.ne.s32.totalorder %s1543_s17, 0 }
  0x5a   : > { %p1547_p1 = scmp.eq.s32.totalorder (!%p1546_p9), %s1254_s9, 0 }
  0x5b   : > { %298 = sbr.rel (%p1546_p9) target bundleno = 925 (0x39d), region = 48 }
  0x62   : > { %1148 = dma.done.wait (%p1547_p1), [#allocation4], 512   ;;  %p1548_p10 = pmov %p1547_p1 }
  0x63   : > { %p1549_p5 = pmov %p1547_p1 }
  0x64   : > { %1150 = vsyncadd (%p1548_p10), [#allocation4], 4294966784 }
  0x65   : > { %1152 = dma.done.wait (%p1549_p5), [#allocation7], 2048   ;;  %p1550_p11 = pmov %p1547_p1 }
  0x66   : > { %s333_s20 = sand.u32 1, %s1169_s28   ;;  %p337_p13 = scmp.lt.s32.totalorder %s1254_s9, 2 }
  0x67   : > { %1154 = vsyncadd (%p1550_p11), [#allocation7], 4294965248  ;;  %s1404_s10 = scalar_lea.vmem [#allocation9], %s333_s20  ;;  %p1551_p4 = scmp.ne.s32.totalorder %s1254_s9, 0 }
  0x68   : > { %s1396_s17 = scalar_select %p337_p13, %s1254_s9, 2 }
  0x69   : > { %344 = sbr.rel (%p1551_p4) target bundleno = 112 (0x70), region = 64  ;;  %v345_v0 = vld [vmem:[%s1521_s1] sm:$0x1] (!%p1551_p4) }
  0x6a   : > { %s339_s26 = scalar_lea.vmem %s1520_s0, %s1396_s17  ;;  %346 = vst [vmem:[#allocation2] sm:$0x1] (!%p1551_p4), %v345_v0 }
  0x70 PF: > { %v967_v1 = vld [vmem:[#allocation6] sm:$0xff]   ;;  %v1184_v2 = vmov 0.0   ;;  %v968_v3 = vld [vmem:[#allocation6 + $0x8] sm:$0xff]   ;;  %vm1185_vm0 = vmmov 0   ;;  %v969_v5 = vld [vmem:[#allocation6 + $0x10] sm:$0xff]   ;;  %vm486_vm1 = vcmask 523264  }
  0x71   : > { %834 = vmatprep.subr.bf16.mxu0 %v1184_v2  ;;  %854 = vmatprep.subr.bf16.mxu1 %v1184_v2  ;;  %v971_v4 = vld [vmem:[#allocation3] sm:$0xff]   ;;  %v973_v6 = vld [vmem:[#allocation3 + $0x8] sm:$0xff]   ;;  %v970_v7 = vld [vmem:[#allocation6 + $0x18] sm:$0xff]   ;;  %vm640_vm2 = vcmask 1040384   ;;  %s1186_s19 = smov [#allocation10]   ;;  %p1552_p8 = scmp.eq.s32.totalorder %s1254_s9, 2 }
  0x72   : > { %835 = vmatpush3.bf16.msra.mxu0 %v967_v1  ;;  %862 = vmatprep.mubr.msk.bf16.mxu1 %vm1185_vm0, %v1184_v2  ;;  %v975_v8 = vld [vmem:[#allocation3 + $0x10] sm:$0xff]   ;;  %v972_v9 = vld [vmem:[#allocation6 + $0x20] sm:$0xff]   ;;  %v977_v10 = vld [vmem:[#allocation3 + $0x18] sm:$0xff]   ;;  %s680_s22 = sshll.u32 %s1186_s19, 4  ;;  %s681_s22 = int_to_ptr.vmem [resolvable:$true] %s680_s22 }
  0x73   : > { %836 = vmatprep.subr.bf16.mxu0 %v1184_v2  ;;  %850 = vmatprep.mubr.msk.bf16.mxu0 %vm1185_vm0, %v1184_v2  ;;  %v974_v11 = vld [vmem:[#allocation6 + $0x28] sm:$0xff]   ;;  %v347_v12 = vld [vmem:[%s339_s26] sm:$0x1]  ;;  %v979_v13 = vld [vmem:[#allocation8] sm:$0xff]   ;;  %s1077_s29 = scalar_lea.vmem %s681_s22, 16  ;;  %s1083_s17 = scalar_lea.vmem %s681_s22, 32 }
  0x74   : > { %855 = vmatpush3.bf16.msra.mxu1 %v971_v4  ;;  %v976_v14 = vld [vmem:[#allocation6 + $0x30] sm:$0xff]   ;;  %v980_v15 = vld [vmem:[#allocation8 + $0x8] sm:$0xff]   ;;  %v978_v16 = vld [vmem:[#allocation6 + $0x38] sm:$0xff]   ;;  %p1078_p7 = scmp.ne.s32.totalorder %s681_s22, %s1077_s29  ;;  %p1084_p3 = scmp.lt.s32.totalorder %s681_s22, %s681_s22 }
  0x75   : > { %856 = vmatprep.subr.bf16.mxu1 %v1184_v2  ;;  %v348_v17 = vld [vmem:[#allocation2] sm:$0x1]  ;;  %v981_v18 = vld [vmem:[#allocation8 + $0x10] sm:$0xff]   ;;  %v983_v21 = vld [vmem:[#allocation8 + $0x20] sm:$0xff]   ;;  %p1085_p2 = scmp.lt.s32.totalorder %s1083_s17, %s1077_s29 }
  0x76   : > { %837 = vmatpush3.bf16.msra.mxu0 %v968_v3  ;;  %v357_v19 = vpack.c.bf16 %v348_v17, %v348_v17  ;;  %v982_v20 = vld [vmem:[#allocation8 + $0x18] sm:$0xff]   ;;  %v984_v22 = vld [vmem:[#allocation8 + $0x28] sm:$0xff]   ;;  %v985_v23 = vld [vmem:[#allocation8 + $0x30] sm:$0xff]   ;;  %p1079_p12 = pnand %p1078_p7, %p1552_p8 }
  0x77   : > { %838 = vmatprep.subr.bf16.mxu0 %v1184_v2  ;;  %v986_v24 = vld [vmem:[#allocation8 + $0x38] sm:$0xff]   ;;  %p1086_p6 = por %p1085_p2, %p1084_p3 }
  0x78   : > { %857 = vmatpush3.bf16.msra.mxu1 %v973_v6  ;;  %v530_v30 = vld [vmem:[%s1524_s4] sm:$0x1]  ;;  %p1080_p0 = pneg %p1079_p12 }
  0x79   : > { %858 = vmatprep.subr.bf16.mxu1 %v1184_v2  ;;  %v551_v38 = vld [vmem:[%s1526_s6] sm:$0x1] }
  0x7a   : > { %839 = vmatpush3.bf16.msra.mxu0 %v969_v5  ;;  %p1087_p9 = pnand %p1086_p6, %p1080_p0 }
  0x7b   : > { %840 = vmatprep.subr.bf16.mxu0 %v1184_v2 }
  0x7c   : > { %859 = vmatpush3.bf16.msra.mxu1 %v975_v8 }
  0x7d   : > { %860 = vmatprep.subr.bf16.mxu1 %v1184_v2 }
  0x7e   : > { %841 = vmatpush3.bf16.msra.mxu0 %v970_v7 }
  0x7f   : > { %842 = vmatprep.subr.bf16.mxu0 %v1184_v2 }
  0x80   : > { %861 = vmatpush3.bf16.msra.mxu1 %v977_v10 }
  0x81   : > { %866 = vmatprep.subr.bf16.mxu1 %v1184_v2 }
  0x82   : > { %843 = vmatpush3.bf16.msra.mxu0 %v972_v9 }
  0x83   : > { %844 = vmatprep.subr.bf16.mxu0 %v1184_v2  ;;  %863 = vmatmul.mubr.msk.bf16.vlgmr.msra.gmra.mrb[0].mxu1 %vm486_vm1, %v347_v12 }
  0x84   : > { %867 = vmatpush3.bf16.msra.mxu1 %v979_v13  ;;  %882 = vmatprep.mubr.msk.bf16.mxu1 %vm1185_vm0, %v1184_v2 }
  0x85   : > { %868 = vmatprep.subr.bf16.mxu1 %v1184_v2 }
  0x86   : > { %845 = vmatpush3.bf16.msra.mxu0 %v974_v11 }
  0x87   : > { %846 = vmatprep.subr.bf16.mxu0 %v1184_v2 }
  0x88   : > { %869 = vmatpush3.bf16.msra.mxu1 %v980_v15 }
  0x89   : > { %870 = vmatprep.subr.bf16.mxu1 %v1184_v2 }
  0x8a   : > { %847 = vmatpush3.bf16.msra.mxu0 %v976_v14 }
  0x8b   : > { %848 = vmatprep.subr.bf16.mxu0 %v1184_v2 }
  0x8c   : > { %871 = vmatpush3.bf16.msra.mxu1 %v981_v18 }
  0x8d   : > { %872 = vmatprep.subr.bf16.mxu1 %v1184_v2 }
  0x8e   : > { %849 = vmatpush3.bf16.msra.mxu0 %v978_v16 }
  0x90   : > { %873 = vmatpush3.bf16.msra.mxu1 %v982_v20 }
  0x91   : > { %851 = vmatmul.mubr.bf16.vlgmr.msra.gmra.mrb[0].mxu0 %v357_v19  ;;  %874 = vmatprep.subr.bf16.mxu1 %v1184_v2 }
  0x94   : > { %875 = vmatpush3.bf16.msra.mxu1 %v983_v21 }
  0x95   : > { %876 = vmatprep.subr.bf16.mxu1 %v1184_v2 }
  0x98   : > { %877 = vmatpush3.bf16.msra.mxu1 %v984_v22 }
  0x99   : > { %878 = vmatprep.subr.bf16.mxu1 %v1184_v2 }
  0x9c   : > { %879 = vmatpush3.bf16.msra.mxu1 %v985_v23 }
  0x9d   : > { %880 = vmatprep.subr.bf16.mxu1 %v1184_v2 }
  0xa0   : > { %881 = vmatpush3.bf16.msra.mxu1 %v986_v24 }
 0x156   : > { %v524_v25 = vpop.f32.mrb[0].mxu1 }
 0x157   : > { %v864_v26 = vpop.f32.mrb[1].mxu1 }
 0x158   : > { %v527_v27 = vpop.f32.mrb[2].mxu1 }
 0x159   : > { %v865_v28 = vpop.f32.mrb[3].mxu1 }
 0x164   : > { %v456_v29 = vpop.f32.mrb[0].mxu0 }
 0x165   : > { %v525_v31 = vadd.f32 %v524_v25, %v456_v29  ;;  %v852_v32 = vpop.f32.mrb[1].mxu0 }
 0x166   : > { %v459_v33 = vpop.f32.mrb[2].mxu0 }
 0x167   : > { %v531_v34 = vadd.f32 %v530_v30, %v525_v31  ;;  %v853_v35 = vpop.f32.mrb[3].mxu0 }
 0x169   : > { %987 = vtanh.f32 %v531_v34 }
 0x173   : > { %v988_v36 = vpop.eup %987 }
 0x174   : > { %533 = vst [vmem:[#allocation2] sm:$0x1] %v988_v36  ;;  %655 = vst [vmem:[#allocation10] sm:$0x1] %v988_v36  ;;  %v534_v37 = vpack.c.bf16 %v988_v36, %v988_v36 }
 0x176   : > { %883 = vmatmul.mubr.bf16.vlgmr.msra.gmra.mrb[4].mxu1 %v534_v37 }
 0x249   : > { %v634_v39 = vpop.f32.mrb[4].mxu1 }
 0x24a   : > { %v635_v40 = vadd.f32 %v634_v39, %v551_v38  ;;  %v884_v41 = vpop.f32.mrb[5].mxu1 }
 0x24b   : > { %v637_v42 = vpop.f32.mrb[6].mxu1 }
 0x24c   : > { %v885_v43 = vpop.f32.mrb[7].mxu1  ;;  %v641_v44 = vsel %vm640_vm2, %v635_v40, -inf }
 0x24d   : > { %642 = vmax.xlane.f32.xlu0 %v641_v44 }
 0x2da   : > { %v643_v45 = vpop.xlane.xlu0 %642 }
 0x2db   : > { %v644_v46 = vsub.f32 %v635_v40, %v643_v45 }
 0x2dd   : > { %v645_v47 = vmul.f32 1.442695, %v644_v46 }
 0x2df   : > { %989 = vpow2.f32 %v645_v47 }
 0x2e9   : > { %v990_v48 = vpop.eup %989 }
 0x2ea   : > { %v647_v49 = vsel %vm640_vm2, %v990_v48, 0.0 }
 0x2eb   : > { %648 = vadd.xlane.f32.xlu0 %v647_v49 }
 0x2ec   : > { %1090 = shalt.err (!%p1087_p9)
}
 0x2ed   : > { %s1091_s26 = scalar_lea.hbm %s1528_s8, 16  ;;  %p1553_p10 = pmov %p1552_p8 }
 0x2ee   : > { %p1092_p1 = scmp.ne.s32.totalorder %s1528_s8, %s1091_s26  ;;  %p1097_p13 = scmp.lt.u32.totalorder %s1091_s26, %s1528_s8 }
 0x2f0   : > { %p1093_p5 = pnand %p1092_p1, %p1553_p10 }
 0x2f2   : > { %p1094_p11 = pneg %p1093_p5 }
 0x2f4   : > { %p1099_p4 = pnand %p1097_p13, %p1094_p11 }
 0x2f6   : > { %1102 = shalt.err (!%p1099_p4)
}
 0x2f7   : > { %p1554_p7 = pmov %p1552_p8  ;;  %s806_s23 = sshll.u32 %s1254_s9, 4 }
 0x2f8   : > { %s669_s25 = sshll.u32 %s1404_s10, 4  ;;  %s1471_s17 = scalar_lea.hbm %s1527_s7, %s806_s23  ;;  %s1473_s25 = int_to_ptr.vmem [resolvable:$true] %s669_s25 }
 0x2f9   : > { %900 = dma.vmem_to_hbm [thread:$0]  (%p1554_p7), %s681_s22, 16, %s1528_s8, [#allocation11]  }
 0x2fa   : > { %s657_s22 = scalar_lea.sflag [#allocation5], %s333_s20  ;;  %s1103_s24 = scalar_lea.vmem %s1473_s25, 16 }
 0x2fb   : > { %p1104_p8 = scmp.ne.s32.totalorder %s1473_s25, %s1103_s24  ;;  %p1555_p12 = scmp.ne.s32.totalorder %s1540_s15, 0 }
 0x2fc   : > { %s1187_s18 = smov [#allocation9]  }
 0x2fd   : > { %p1105_p0 = pnand %p1104_p8, %p1555_p12  ;;  %s1107_s26 = sshll.u32 %s1187_s18, 4  ;;  %s1108_s26 = int_to_ptr.vmem [resolvable:$false] %s1107_s26 }
 0x2fe   : > { %s1109_s11 = scalar_lea.vmem %s1108_s26, 32  ;;  %p1110_p2 = scmp.lt.s32.totalorder %s1473_s25, %s1108_s26 }
 0x2ff   : > { %p1106_p3 = pneg %p1105_p0  ;;  %p1111_p6 = scmp.lt.s32.totalorder %s1109_s11, %s1103_s24 }
 0x301   : > { %p1112_p9 = por %p1111_p6, %p1110_p2 }
 0x303   : > { %p1113_p1 = pnand %p1112_p9, %p1106_p3 }
 0x378   : > { %v649_v50 = vpop.xlane.xlu0 %648 }
 0x379   : > { %991 = vlog2.f32 %v649_v50 }
 0x383   : > { %v992_v51 = vpop.eup %991 }
 0x384   : > { %v651_v52 = vmul.f32 0.6931472, %v992_v51 }
 0x386   : > { %v652_v53 = vadd.f32 %v651_v52, %v643_v45 }
 0x388   : > { %v653_v54 = vsub.f32 %v635_v40, %v652_v53 }
 0x38a   : > { %654 = vst [vmem:[%s1404_s10] sm:$0x1] %v653_v54 }
 0x38b   : > { %1116 = shalt.err (!%p1113_p1)
}
 0x38c   : > { %s1117_s20 = scalar_lea.hbm %s1471_s17, 16  ;;  %s1121_s16 = scalar_lea.hbm %s1527_s7, 48 }
 0x38d   : > { %p1118_p10 = scmp.ne.s32.totalorder %s1471_s17, %s1117_s20  ;;  %p1122_p13 = scmp.lt.u32.totalorder %s1471_s17, %s1527_s7 }
 0x38e   : > { %p1123_p4 = scmp.lt.u32.totalorder %s1121_s16, %s1117_s20  ;;  %p1125_p8 = scmp.lt.u32.totalorder %s1117_s20, %s1471_s17 }
 0x38f   : > { %p1119_p5 = pnand %p1118_p10, %p1555_p12 }
 0x390   : > { %p1124_p7 = por %p1123_p4, %p1122_p13 }
 0x391   : > { %p1120_p11 = pneg %p1119_p5 }
 0x392   : > { %p1126_p0 = por %p1125_p8, %p1124_p7 }
 0x394   : > { %p1127_p3 = pnand %p1126_p0, %p1120_p11 }
 0x396   : > { %1130 = shalt.err (!%p1127_p3)
}
 0x397   : > { %898 = dma.vmem_to_hbm [thread:$0]  (%p1555_p12), %s1473_s25, 16, %s1471_s17, %s657_s22  }
 0x398   : > { %p1556_p2 = scmp.eq.s32.totalorder %s1254_s9, 2 }
 0x39a   : > { %1156 = dma.done.wait (%p1556_p2), [#allocation11], 16   ;;  %p1557_p6 = pmov %p1556_p2 }
 0x39c   : > { %1158 = vsyncadd (%p1557_p6), [#allocation11], 4294967280 }
 0x39d PF: > { %s1558_s21 = sld [smem:[#allocation19_spill]]  ;;  %p926_p9 = scmp.ge.s32.totalorder %s1177_s30, 2 }
 0x39e   : > { %s696_s23 = sand.u32 1, %s1165_s27  }
 0x39f   : > { %s697_s19 = scalar_lea.sflag [#allocation5], %s696_s23 }
 0x3a3   : > { %p1559_p1 = scmp.ne.s32.totalorder %s1558_s21, 0 }
 0x3a5   : > { %p915_p10 = pnand %p926_p9, %p1559_p1 }
 0x3a7   : > { %1160 = dma.done.wait (!%p915_p10), %s697_s19, 16  }
 0x3a8   : > { %1162 = vsyncadd (!%p915_p10), %s697_s19, 4294967280  ;;  %s1560_s30 = sld [smem:[#allocation17_spill]]  ;;  %s1561_s15 = sld [smem:[#allocation16_spill]] }
 0x3a9   : > { %s1562_s29 = sld [smem:[#allocation18_spill]]  ;;  %s1563_s27 = smov %s1169_s28 }
 0x3ae   : > { %p22_p12 = scmp.ge.s32.totalorder %s1560_s30, 5   ;;  %s1564_s28 = smov %s1561_s15 }
 0x3b0   :  { %24 = sbr.rel (!%p22_p12) target bundleno = 6 (0x6), region = 108 }
 0x3b7   :  { %701 = vsyncpa [#allocation4], 1 }
 0x3b8   :  { %703 = vsyncpa [#allocation4 + $0x1], 1 }
 0x3b9   :  { %704 = vsyncpa [#allocation7], 1 }
 0x3ba   :  { %705 = vsyncpa [#allocation5], 1 }
 0x3bb   :  { %707 = vsyncpa [#allocation5 + $0x1], 1 }
 0x3bc   :  { %708 = vsyncpa [#allocation11], 1 }

</bundles_post_ra>
